<compile_context>
chip_gen: v6e
topology: v6e:2x2x1
jax: 0.10.0
libtpu: 0.0.40
codegen_flags: <defaults>
</compile_context>

<pallas_src>
import functools

import jax
import jax.numpy as jnp
from jax.experimental import pallas as pl
from jax.experimental.pallas import tpu as pltpu


def _upscale_conv_kernel(x_ref, a_ref, btw_ref, o_ref):
    """Fused nearest-upsample + valid conv for the whole batch.

    x_ref:   (Hin, N*Cin*Win)            input, H on sublanes, (n, ci, w) on lanes
    a_ref:   (KH, Ho, Hin)               one-hot row selectors (tap shift baked in)
    btw_ref: (KH, N*Cin*Win, N*Cout*Wo)  weighted, batch-block-diagonal column
                                         selectors (kw + ci + conv weight folded in)
    o_ref:   (Ho, N*Cout*Wo)             output slab, (n, co, w) on lanes
    """
    kh_taps = a_ref.shape[0]
    acc = jnp.zeros(o_ref.shape, jnp.float32)
    for kh in range(kh_taps):
        # Rows [kh, kh+Ho) of the H-upsampled image, all (n, ci) at once (MXU).
        rows = jnp.dot(a_ref[kh], x_ref[...],
                       preferred_element_type=jnp.float32)          # (Ho, N*Cin*Win)
        # Weighted W-upsample + kw/ci contraction for this kh: one MXU matmul.
        acc = acc + jnp.dot(rows, btw_ref[kh],
                            preferred_element_type=jnp.float32)     # (Ho, N*Cout*Wo)
    o_ref[...] = acc.astype(o_ref.dtype)


@functools.partial(jax.jit, static_argnames=("size",))
def upscale_module_forward(x_nchw, weight_oihw, size):
    """Equivalent of UpscaleModule.forward(x, size).

    x_nchw:      (N, Cin, Hin, Win)
    weight_oihw: (Cout, Cin, KH, KW)   (PyTorch Conv2d weight layout, bias=False)
    size:        (Hout, Wout) target size for nearest interpolation
    returns:     (N, Cout, Hout-KH+1, Wout-KW+1) in NCHW
    """
    N, Cin, Hin, Win = x_nchw.shape
    Cout, _, KH, KW = weight_oihw.shape
    Hout, Wout = size
    Ho, Wo = Hout - KH + 1, Wout - KW + 1
    assert Ho >= 1 and Wo >= 1, "interpolated size must be >= kernel_size"

    f32 = jnp.float32

    # Exact integer nearest indices (torch mode='nearest': floor(i * in / out)).
    h_idx = (jnp.arange(Hout, dtype=jnp.int32) * Hin) // Hout        # (Hout,)
    w_idx = (jnp.arange(Wout, dtype=jnp.int32) * Win) // Wout        # (Wout,)

    # One-hot H selectors with the per-tap shift baked in: (KH, Ho, Hin).
    h_onehot = (h_idx[:, None] == jnp.arange(Hin, dtype=jnp.int32)[None, :]).astype(f32)
    a_taps = jnp.stack([h_onehot[kh:kh + Ho] for kh in range(KH)])

    # One-hot W selectors (transposed) with per-tap shift: (KW, Win, Wo).
    w_onehot = (w_idx[:, None] == jnp.arange(Win, dtype=jnp.int32)[None, :]).astype(f32)
    bt_taps = jnp.stack([w_onehot[kw:kw + Wo].T for kw in range(KW)])

    # Fold kw + conv weight into the column selectors:
    #   btw_small[kh, ci*Win + c, co*Wo + x] = sum_kw w[co,ci,kh,kw] * bt_taps[kw,c,x]
    btw_small = jnp.einsum("oikl,lcx->kicox", weight_oihw.astype(f32), bt_taps)
    btw_small = btw_small.reshape(KH, Cin * Win, Cout * Wo)
    # Batch-block-diagonal so the whole batch rides the lane axis of one matmul.
    eye_n = jnp.eye(N, dtype=f32)
    btw = jnp.einsum("mn,kcx->kmcnx", eye_n, btw_small)
    btw = btw.reshape(KH, N * Cin * Win, N * Cout * Wo)

    # Input as (Hin, N*Cin*Win): H on sublanes, (n, ci, w) flattened onto lanes.
    x_all = jnp.transpose(x_nchw, (2, 0, 1, 3)).reshape(Hin, N * Cin * Win).astype(f32)

    out_slab = pl.pallas_call(
        _upscale_conv_kernel,
        out_shape=jax.ShapeDtypeStruct((Ho, N * Cout * Wo), jnp.float32),
        in_specs=[
            pl.BlockSpec(memory_space=pltpu.MemorySpace.VMEM),
            pl.BlockSpec(memory_space=pltpu.MemorySpace.VMEM),
            pl.BlockSpec(memory_space=pltpu.MemorySpace.VMEM),
        ],
        out_specs=pl.BlockSpec(memory_space=pltpu.MemorySpace.VMEM),
    )(x_all, a_taps, btw)

    # Undo the lane packing: (Ho, N*Cout*Wo) -> (N, Cout, Ho, Wo).  Cheap (~3K elems).
    out = jnp.transpose(out_slab.reshape(Ho, N, Cout, Wo), (1, 2, 0, 3))
    return out.astype(x_nchw.dtype)


if __name__ == "__main__":
    # UpscaleModule(in_channels=4, out_channels=8, kernel_size=3)
    #   x: (2, 4, 8, 8), size=(16, 16)  ->  output (2, 8, 14, 14)
    key = jax.random.PRNGKey(0)
    k_x, k_w = jax.random.split(key)

    N, Cin, Hin, Win = 2, 4, 8, 8
    Cout, KH, KW = 8, 3, 3
    size = (16, 16)

    x = jax.random.normal(k_x, (N, Cin, Hin, Win), dtype=jnp.float32)
    weight = 0.1 * jax.random.normal(k_w, (Cout, Cin, KH, KW), dtype=jnp.float32)

    out = upscale_module_forward(x, weight, size)
    out = jax.block_until_ready(out)

    # Reference: exact integer-index nearest upsample + XLA conv (full f32 precision).
    h_idx = (jnp.arange(size[0], dtype=jnp.int32) * Hin) // size[0]
    w_idx = (jnp.arange(size[1], dtype=jnp.int32) * Win) // size[1]
    x_up = x[:, :, h_idx, :][:, :, :, w_idx]
    ref_nhwc = jax.lax.conv_general_dilated(
        jnp.transpose(x_up, (0, 2, 3, 1)),
        jnp.transpose(weight, (2, 3, 1, 0)),
        window_strides=(1, 1),
        padding="VALID",
        dimension_numbers=("NHWC", "HWIO", "NHWC"),
        precision=jax.lax.Precision.HIGHEST,
    )
    ref = jnp.transpose(ref_nhwc, (0, 3, 1, 2))

    assert out.shape == (N, Cout, size[0] - KH + 1, size[1] - KW + 1), out.shape
    max_err = float(jnp.max(jnp.abs(out - ref)))
    assert jnp.allclose(out, ref, atol=2e-3, rtol=2e-3), f"mismatch vs reference, max_err={max_err}"

    print("KERNEL_OK")
</pallas_src>

<mosaic_0001>
module attributes {stable_mosaic.version = 11 : i64} {
  func.func @_upscale_conv_kernel(%arg0: memref<8x64xf32, #tpu.memory_space<vmem>>, %arg1: memref<3x14x8xf32, #tpu.memory_space<vmem>>, %arg2: memref<3x64x224xf32, #tpu.memory_space<vmem>>, %arg3: memref<14x224xf32, #tpu.memory_space<vmem>>) attributes {dimension_semantics = [], scalar_prefetch = 0 : i64, scratch_operands = 0 : i64, tpu.core_type = #tpu.core_type<tc>} {
    %cst = arith.constant 0.000000e+00 : f32
    %0 = vector.broadcast %cst : f32 to vector<14x224xf32>
    %c0 = arith.constant 0 : index
    %c0_0 = arith.constant 0 : index
    %c0_1 = arith.constant 0 : index
    %1 = vector.load %arg1[%c0, %c0_0, %c0_1] : memref<3x14x8xf32, #tpu.memory_space<vmem>>, vector<1x14x8xf32>
    %2 = vector.shape_cast %1 : vector<1x14x8xf32> to vector<14x8xf32>
    %c0_2 = arith.constant 0 : index
    %c0_3 = arith.constant 0 : index
    %3 = vector.load %arg0[%c0_2, %c0_3] : memref<8x64xf32, #tpu.memory_space<vmem>>, vector<8x64xf32>
    %cst_4 = arith.constant dense<0.000000e+00> : vector<14x64xf32>
    %4 = tpu.matmul %2, %3, %cst_4 {dimension_numbers = #tpu.dot_dimension_numbers<[1], [0], [0], [1], [0, 0, 1, 1], [], []>} : vector<14x8xf32>, vector<8x64xf32>, vector<14x64xf32> -> vector<14x64xf32>
    %c0_5 = arith.constant 0 : index
    %c0_6 = arith.constant 0 : index
    %c0_7 = arith.constant 0 : index
    %5 = vector.load %arg2[%c0_5, %c0_6, %c0_7] : memref<3x64x224xf32, #tpu.memory_space<vmem>>, vector<1x64x224xf32>
    %6 = vector.shape_cast %5 : vector<1x64x224xf32> to vector<64x224xf32>
    %cst_8 = arith.constant dense<0.000000e+00> : vector<14x224xf32>
    %7 = tpu.matmul %4, %6, %cst_8 {dimension_numbers = #tpu.dot_dimension_numbers<[1], [0], [0], [1], [0, 0, 1, 1], [], []>} : vector<14x64xf32>, vector<64x224xf32>, vector<14x224xf32> -> vector<14x224xf32>
    %8 = arith.addf %0, %7 : vector<14x224xf32>
    %c1 = arith.constant 1 : index
    %c0_9 = arith.constant 0 : index
    %c0_10 = arith.constant 0 : index
    %9 = vector.load %arg1[%c1, %c0_9, %c0_10] : memref<3x14x8xf32, #tpu.memory_space<vmem>>, vector<1x14x8xf32>
    %10 = vector.shape_cast %9 : vector<1x14x8xf32> to vector<14x8xf32>
    %c0_11 = arith.constant 0 : index
    %c0_12 = arith.constant 0 : index
    %11 = vector.load %arg0[%c0_11, %c0_12] : memref<8x64xf32, #tpu.memory_space<vmem>>, vector<8x64xf32>
    %cst_13 = arith.constant dense<0.000000e+00> : vector<14x64xf32>
    %12 = tpu.matmul %10, %11, %cst_13 {dimension_numbers = #tpu.dot_dimension_numbers<[1], [0], [0], [1], [0, 0, 1, 1], [], []>} : vector<14x8xf32>, vector<8x64xf32>, vector<14x64xf32> -> vector<14x64xf32>
    %c1_14 = arith.constant 1 : index
    %c0_15 = arith.constant 0 : index
    %c0_16 = arith.constant 0 : index
    %13 = vector.load %arg2[%c1_14, %c0_15, %c0_16] : memref<3x64x224xf32, #tpu.memory_space<vmem>>, vector<1x64x224xf32>
    %14 = vector.shape_cast %13 : vector<1x64x224xf32> to vector<64x224xf32>
    %cst_17 = arith.constant dense<0.000000e+00> : vector<14x224xf32>
    %15 = tpu.matmul %12, %14, %cst_17 {dimension_numbers = #tpu.dot_dimension_numbers<[1], [0], [0], [1], [0, 0, 1, 1], [], []>} : vector<14x64xf32>, vector<64x224xf32>, vector<14x224xf32> -> vector<14x224xf32>
    %16 = arith.addf %8, %15 : vector<14x224xf32>
    %c2 = arith.constant 2 : index
    %c0_18 = arith.constant 0 : index
    %c0_19 = arith.constant 0 : index
    %17 = vector.load %arg1[%c2, %c0_18, %c0_19] : memref<3x14x8xf32, #tpu.memory_space<vmem>>, vector<1x14x8xf32>
    %18 = vector.shape_cast %17 : vector<1x14x8xf32> to vector<14x8xf32>
    %c0_20 = arith.constant 0 : index
    %c0_21 = arith.constant 0 : index
    %19 = vector.load %arg0[%c0_20, %c0_21] : memref<8x64xf32, #tpu.memory_space<vmem>>, vector<8x64xf32>
    %cst_22 = arith.constant dense<0.000000e+00> : vector<14x64xf32>
    %20 = tpu.matmul %18, %19, %cst_22 {dimension_numbers = #tpu.dot_dimension_numbers<[1], [0], [0], [1], [0, 0, 1, 1], [], []>} : vector<14x8xf32>, vector<8x64xf32>, vector<14x64xf32> -> vector<14x64xf32>
    %c2_23 = arith.constant 2 : index
    %c0_24 = arith.constant 0 : index
    %c0_25 = arith.constant 0 : index
    %21 = vector.load %arg2[%c2_23, %c0_24, %c0_25] : memref<3x64x224xf32, #tpu.memory_space<vmem>>, vector<1x64x224xf32>
    %22 = vector.shape_cast %21 : vector<1x64x224xf32> to vector<64x224xf32>
    %cst_26 = arith.constant dense<0.000000e+00> : vector<14x224xf32>
    %23 = tpu.matmul %20, %22, %cst_26 {dimension_numbers = #tpu.dot_dimension_numbers<[1], [0], [0], [1], [0, 0, 1, 1], [], []>} : vector<14x64xf32>, vector<64x224xf32>, vector<14x224xf32> -> vector<14x224xf32>
    %24 = arith.addf %16, %23 : vector<14x224xf32>
    %c0_27 = arith.constant 0 : index
    %c0_28 = arith.constant 0 : index
    %25 = vector.load %arg3[%c0_27, %c0_28] : memref<14x224xf32, #tpu.memory_space<vmem>>, vector<14x224xf32>
    tpu.vector_store %arg3[%c0_27, %c0_28], %24 {strides = array<i32>} : memref<14x224xf32, #tpu.memory_space<vmem>>, vector<14x224xf32>,
    return
  }
}

</mosaic_0001>

<bundles_post_ra>
// kernel: upscale_module_forward.1
= control target key start
LH: loop header
LB: loop body
LE: loop exit
PB: predicated region body
PF: predicated region fallthrough
CT: control target
= control target key end

     0   :  { %vm17_vm0 = vcmask 64512   ;;  %v654_v34 = vmov 0.0   ;;  %vm216_vm1 = vcmask 523264   ;;  %vm572_vm2 = vcmask 785408   ;;  %s878_s0 = inlined_call_operand.vmem [shape: f32[8,64], index: 0, kind: input, shape index: {}]   ;;  %s879_s1 = inlined_call_operand.vmem [shape: f32[3,14,8], index: 1, kind: input, shape index: {}]   ;;  %s880_s2 = inlined_call_operand.vmem [shape: f32[3,64,224], index: 2, kind: input, shape index: {}]   ;;  %s881_s3 = inlined_call_operand.vmem [shape: f32[14,224], index: 3, kind: output, shape index: {}]  }
   0x1   :  { %v678_v0 = vld [vmem:[%s878_s0] sm:$0xff]  ;;  %v15_v2 = vld [vmem:[%s879_s1 + $0x8] sm:$0x3f]  ;;  %v583_v3 = vld [vmem:[%s879_s1 + $0x10] sm:$0xff]  ;;  %370 = vmatprep.mubr.f32.mxu1 %v654_v34  ;;  %vm575_vm3 = vcmask 783360  }
   0x2   :  { %v14_v1 = vld [vmem:[%s879_s1] sm:$0xff]  ;;  %638 = vmatprep.subr.mxu0 %v678_v0  ;;  %v114_v4 = vld [vmem:[%s880_s2 + $0x78] sm:$0xff]  ;;  %v113_v5 = vld [vmem:[%s880_s2 + $0x70] sm:$0xff] }
   0x3   :  { %640 = vmatprep.mubr.msk.f32.mxu0 %vm17_vm0, %v14_v1  ;;  %639 = vmatpush3.msra.mxu0 %v678_v0  ;;  %v112_v6 = vld [vmem:[%s880_s2 + $0x68] sm:$0xff]  ;;  %v602_v7 = vld [vmem:[%s880_s2 + $0xf8] sm:$0xff]  ;;  %v111_v9 = vld [vmem:[%s880_s2 + $0x60] sm:$0xff] }
   0x4   :  { %322 = vmatprep.subr.mxu1 %v114_v4  ;;  %641 = vmatmul.mubr.msk.f32.vlgmr.msra.gmra.mxu0 %vm17_vm0, %v15_v2  ;;  %v584_v8 = vld [vmem:[%s879_s1 + $0x18] sm:$0x3f]  ;;  %v601_v11 = vld [vmem:[%s880_s2 + $0xf0] sm:$0xff]  ;;  %v600_v13 = vld [vmem:[%s880_s2 + $0xe8] sm:$0xff] }
   0x5   :  { %643 = vmatprep.subr.mxu0 %v678_v0  ;;  %645 = vmatprep.mubr.msk.f32.mxu0 %vm17_vm0, %v583_v3  ;;  %v110_v10 = vld [vmem:[%s880_s2 + $0x58] sm:$0xff]  ;;  %v109_v12 = vld [vmem:[%s880_s2 + $0x50] sm:$0xff]  ;;  %v108_v14 = vld [vmem:[%s880_s2 + $0x48] sm:$0xff] }
   0x6   :  { %644 = vmatpush3.msra.mxu0 %v678_v0  ;;  %323 = vmatpush1.msra.mxu1 %v113_v5  ;;  %v599_v15 = vld [vmem:[%s880_s2 + $0xe0] sm:$0xff]  ;;  %v598_v17 = vld [vmem:[%s880_s2 + $0xd8] sm:$0xff]  ;;  %v597_v19 = vld [vmem:[%s880_s2 + $0xd0] sm:$0xff] }
   0x7   :  { %239 = vmatprep.subr.mxu0 %v602_v7  ;;  %324 = vmatprep.subr.mxu1 %v112_v6  ;;  %v107_v16 = vld [vmem:[%s880_s2 + $0x40] sm:$0xff]  ;;  %v106_v18 = vld [vmem:[%s880_s2 + $0x38] sm:$0xff]  ;;  %v105_v20 = vld [vmem:[%s880_s2 + $0x30] sm:$0xff] }
   0x8   :  { %646 = vmatmul.mubr.msk.f32.vlgmr.msra.gmra.mxu0 %vm17_vm0, %v584_v8  ;;  %325 = vmatpush1.msra.mxu1 %v111_v9  ;;  %v596_v21 = vld [vmem:[%s880_s2 + $0xc8] sm:$0xff]  ;;  %v595_v23 = vld [vmem:[%s880_s2 + $0xc0] sm:$0xff]  ;;  %v594_v25 = vld [vmem:[%s880_s2 + $0xb8] sm:$0xff] }
   0x9   :  { %326 = vmatprep.subr.mxu1 %v110_v10  ;;  %240 = vmatpush1.msra.mxu0 %v601_v11  ;;  %v104_v22 = vld [vmem:[%s880_s2 + $0x28] sm:$0xff]  ;;  %v103_v24 = vld [vmem:[%s880_s2 + $0x20] sm:$0xff]  ;;  %v102_v26 = vld [vmem:[%s880_s2 + $0x18] sm:$0xff] }
   0xa   :  { %327 = vmatpush1.msra.mxu1 %v109_v12  ;;  %241 = vmatprep.subr.mxu0 %v600_v13  ;;  %v593_v27 = vld [vmem:[%s880_s2 + $0xb0] sm:$0xff]  ;;  %v592_v29 = vld [vmem:[%s880_s2 + $0xa8] sm:$0xff]  ;;  %v591_v31 = vld [vmem:[%s880_s2 + $0xa0] sm:$0xff] }
   0xb   :  { %328 = vmatprep.subr.mxu1 %v108_v14  ;;  %242 = vmatpush1.msra.mxu0 %v599_v15  ;;  %v101_v28 = vld [vmem:[%s880_s2 + $0x10] sm:$0xff]  ;;  %v100_v30 = vld [vmem:[%s880_s2 + $0x8] sm:$0xff]  ;;  %v99_v32 = vld [vmem:[%s880_s2] sm:$0xff] }
   0xc   :  { %329 = vmatpush1.msra.mxu1 %v107_v16  ;;  %243 = vmatprep.subr.mxu0 %v598_v17  ;;  %v590_v33 = vld [vmem:[%s880_s2 + $0x98] sm:$0xff]  ;;  %v589_v35 = vld [vmem:[%s880_s2 + $0x90] sm:$0xff]  ;;  %v588_v36 = vld [vmem:[%s880_s2 + $0x88] sm:$0xff] }
   0xd   :  { %330 = vmatprep.subr.mxu1 %v106_v18  ;;  %244 = vmatpush1.msra.mxu0 %v597_v19  ;;  %v587_v37 = vld [vmem:[%s880_s2 + $0x80] sm:$0xff]  ;;  %v626_v38 = vld [vmem:[%s880_s2 + $0x178] sm:$0xff]  ;;  %v608_v44 = vld [vmem:[%s879_s1 + $0x28] sm:$0x3f] }
   0xe   :  { %331 = vmatpush1.msra.mxu1 %v105_v20  ;;  %245 = vmatprep.subr.mxu0 %v596_v21  ;;  %v607_v43 = vld [vmem:[%s879_s1 + $0x20] sm:$0xff]  ;;  %v625_v45 = vld [vmem:[%s880_s2 + $0x170] sm:$0xff]  ;;  %v624_v46 = vld [vmem:[%s880_s2 + $0x168] sm:$0xff] }
   0xf   :  { %332 = vmatprep.subr.mxu1 %v104_v22  ;;  %246 = vmatpush1.msra.mxu0 %v595_v23  ;;  %v623_v47 = vld [vmem:[%s880_s2 + $0x160] sm:$0xff]  ;;  %v622_v48 = vld [vmem:[%s880_s2 + $0x158] sm:$0xff]  ;;  %v621_v49 = vld [vmem:[%s880_s2 + $0x150] sm:$0xff] }
  0x10   :  { %333 = vmatpush1.msra.mxu1 %v103_v24  ;;  %247 = vmatprep.subr.mxu0 %v594_v25  ;;  %v620_v50 = vld [vmem:[%s880_s2 + $0x148] sm:$0xff]  ;;  %v619_v51 = vld [vmem:[%s880_s2 + $0x140] sm:$0xff]  ;;  %v618_v52 = vld [vmem:[%s880_s2 + $0x138] sm:$0xff] }
  0x11   :  { %334 = vmatprep.subr.mxu1 %v102_v26  ;;  %248 = vmatpush1.msra.mxu0 %v593_v27  ;;  %v617_v53 = vld [vmem:[%s880_s2 + $0x130] sm:$0xff]  ;;  %v616_v54 = vld [vmem:[%s880_s2 + $0x128] sm:$0xff]  ;;  %v615_v55 = vld [vmem:[%s880_s2 + $0x120] sm:$0xff] }
  0x12   :  { %335 = vmatpush1.msra.mxu1 %v101_v28  ;;  %249 = vmatprep.subr.mxu0 %v592_v29  ;;  %v614_v56 = vld [vmem:[%s880_s2 + $0x118] sm:$0xff]  ;;  %v613_v57 = vld [vmem:[%s880_s2 + $0x110] sm:$0xff]  ;;  %v612_v58 = vld [vmem:[%s880_s2 + $0x108] sm:$0xff] }
  0x13   :  { %336 = vmatprep.subr.mxu1 %v100_v30  ;;  %250 = vmatpush1.msra.mxu0 %v591_v31  ;;  %v611_v59 = vld [vmem:[%s880_s2 + $0x100] sm:$0xff] }
  0x14   :  { %337 = vmatpush1.msra.mxu1 %v99_v32  ;;  %251 = vmatprep.subr.mxu0 %v590_v33 }
  0x15   :  { %252 = vmatpush1.msra.mxu0 %v589_v35  ;;  %287 = vmatprep.mubr.f32.mxu0 %v654_v34 }
  0x16   :  { %253 = vmatprep.subr.mxu0 %v588_v36  ;;  %506 = vmatprep.subr.mxu1 %v626_v38 }
  0x17   :  { %254 = vmatpush1.msra.mxu0 %v587_v37 }
  0x18   :  { %648 = vmatprep.subr.mxu0 %v678_v0 }
  0xc4   :  { %v642_v39 = vpop.f32.mrf.mxu0 }
  0xc6   :  { %v90_v40 = vpop.f32.mrf.mxu0 }
  0xc7   :  { %605 = vmatmul.mubr.msk.f32.vlgmr.msra.gmra.mxu1 %vm216_vm1, %v90_v40 }
  0xc8   :  { %v647_v41 = vpop.f32.mrf.mxu0  ;;  %376 = vmatprep.mubr.f32.mxu1 %v654_v34  ;;  %507 = vmatpush1.msra.mxu1 %v625_v45 }
  0xc9   :  { %508 = vmatprep.subr.mxu1 %v624_v46 }
  0xca   :  { %v190_v42 = vpop.f32.mrf.mxu0  ;;  %509 = vmatpush1.msra.mxu1 %v623_v47 }
  0xcb   :  { %603 = vmatmul.mubr.msk.f32.vlgmr.msra.gmra.mxu0 %vm216_vm1, %v190_v42  ;;  %606 = vmatmul.mubr.msk.f32.gmra.mxu1 %vm216_vm1, %v642_v39 }
  0xcc   :  { %649 = vmatpush3.msra.mxu0 %v678_v0  ;;  %293 = vmatprep.mubr.f32.mxu0 %v654_v34 }
  0xcd   :  { %554 = vmatprep.mubr.f32.mxu1 %v654_v34  ;;  %510 = vmatprep.subr.mxu1 %v622_v48 }
  0xce   :  { %511 = vmatpush1.msra.mxu1 %v621_v49 }
  0xcf   :  { %604 = vmatmul.mubr.msk.f32.gmra.mxu0 %vm216_vm1, %v647_v41  ;;  %512 = vmatprep.subr.mxu1 %v620_v50 }
  0xd0   :  { %650 = vmatprep.mubr.msk.f32.mxu0 %vm17_vm0, %v607_v43  ;;  %513 = vmatpush1.msra.mxu1 %v619_v51 }
  0xd1   :  { %514 = vmatprep.subr.mxu1 %v618_v52 }
  0xd2   :  { %515 = vmatpush1.msra.mxu1 %v617_v53 }
  0xd3   :  { %651 = vmatmul.mubr.msk.f32.vlgmr.msra.gmra.mxu0 %vm17_vm0, %v608_v44  ;;  %516 = vmatprep.subr.mxu1 %v616_v54 }
  0xd4   :  { %517 = vmatpush1.msra.mxu1 %v615_v55 }
  0xd5   :  { %518 = vmatprep.subr.mxu1 %v614_v56 }
  0xd6   :  { %519 = vmatpush1.msra.mxu1 %v613_v57 }
  0xd7   :  { %520 = vmatprep.subr.mxu1 %v612_v58 }
  0xd8   :  { %521 = vmatpush1.msra.mxu1 %v611_v59 }
 0x187   :  { %v372_v2 = vpop.f32.mrf.mxu1 }
 0x189   :  { %v374_v3 = vpop.f32.mrf.mxu1 }
 0x18b   :  { %v289_v60 = vpop.f32.mrf.mxu0  ;;  %v378_v4 = vpop.f32.mrf.mxu1 }
 0x18c   :  { %v373_v6 = vadd.f32 %v372_v2, %v289_v60 }
 0x18d   :  { %v291_v61 = vpop.f32.mrf.mxu0  ;;  %v380_v5 = vpop.f32.mrf.mxu1 }
 0x18e   :  { %v375_v8 = vadd.f32 %v374_v3, %v291_v61 }
 0x18f   :  { %v295_v62 = vpop.f32.mrf.mxu0 }
 0x190   :  { %v379_v11 = vadd.f32 %v378_v4, %v295_v62 }
 0x191   :  { %v297_v63 = vpop.f32.mrf.mxu0 }
 0x192   :  { %v381_v14 = vadd.f32 %v380_v5, %v297_v63 }
 0x193   :  { %v652_v0 = vpop.f32.mrf.mxu0 }
 0x195   :  { %v458_v1 = vpop.f32.mrf.mxu0 }
 0x196   :  { %627 = vmatmul.mubr.msk.f32.vlgmr.msra.gmra.mxu1 %vm216_vm1, %v458_v1 }
 0x197   :  { %560 = vmatprep.mubr.f32.mxu1 %v654_v34 }
 0x19a   :  { %628 = vmatmul.mubr.msk.f32.gmra.mxu1 %vm216_vm1, %v652_v0 }
 0x256   :  { %v556_v7 = vpop.f32.mrf.mxu1 }
 0x257   :  { %v567_v9 = vadd.f32 %v556_v7, %v373_v6 }
 0x258   :  { %v558_v10 = vpop.f32.mrf.mxu1 }
 0x259   :  { %571 = vst [vmem:[%s881_s3] sm:$0xff] %v567_v9  ;;  %v568_v12 = vadd.f32 %v558_v10, %v375_v8 }
 0x25a   :  { %v562_v13 = vpop.f32.mrf.mxu1 }
 0x25b   :  { %573 = vst.msk [vmem:[%s881_s3 + $0x8] sm:$0xff] %vm572_vm2, %v568_v12  ;;  %v569_v15 = vadd.f32 %v562_v13, %v379_v11 }
 0x25c   :  { %v564_v16 = vpop.f32.mrf.mxu1 }
 0x25d   :  { %574 = vst [vmem:[%s881_s3 + $0x10] sm:$0x3f] %v569_v15  ;;  %v570_v17 = vadd.f32 %v564_v16, %v381_v14 }
 0x25f   :  { %576 = vst.msk [vmem:[%s881_s3 + $0x18] sm:$0x3f] %vm575_vm3, %v570_v17 }

</bundles_post_ra>
